<compile_context>
chip_gen: v5e
topology: v5e:2x2
jax: 0.10.0
libtpu: 0.0.40
codegen_flags: <defaults>
</compile_context>

<pallas_src>
import jax
import jax.numpy as jnp
from jax.experimental import pallas as pl
from jax.experimental.pallas import tpu as pltpu


def _mish_kernel(x_ref, o_ref):
    x = x_ref[...].astype(jnp.float32)
    # mish(x) = x * tanh(softplus(x)).  With u = exp(-|x|) (never overflows):
    #   x >= 0: tanh(softplus(x)) = (1 + 2u) / (1 + 2u + 2u^2)
    #   x <  0: tanh(softplus(x)) = (u^2 + 2u) / (u^2 + 2u + 2)
    u = jnp.exp(-jnp.abs(x))
    two_u = 2.0 * u
    u2 = u * u
    pos = x >= 0.0
    num = jnp.where(pos, 1.0 + two_u, u2 + two_u)
    den = jnp.where(pos, 1.0 + two_u + 2.0 * u2, u2 + two_u + 2.0)
    t = num * pl.reciprocal(den, approx=False)  # exact recip keeps 1e-5 tol
    o_ref[...] = (x * t).astype(o_ref.dtype)


def mish(x, *, row_tile=2048):
    """Elementwise Mish via Pallas. Accepts any shape / float dtype."""
    orig_shape = x.shape
    orig_dtype = x.dtype

    flat = x.reshape(-1)
    n = flat.shape[0]
    lane = 128

    # Pad only when the flat length isn't a multiple of 128 (needed for the
    # lane-dense 2D view). Common conv-shaped tensors take the no-pad path.
    rem = n % lane
    padded = rem != 0
    if padded:
        flat = jnp.pad(flat, (0, lane - rem))
    rows = flat.shape[0] // lane
    x2d = flat.reshape(rows, lane)

    # Block: (row_tile, 128). row_tile is floored to a multiple of 8 so the
    # (8,128) block constraint holds; if rows < row_tile the block spans the
    # full array (always legal). Ragged last block is masked by Pallas.
    row_tile = max(8, (row_tile // 8) * 8)
    tile_r = min(row_tile, rows)
    grid = (pl.cdiv(rows, tile_r),)

    out2d = pl.pallas_call(
        _mish_kernel,
        out_shape=jax.ShapeDtypeStruct((rows, lane), orig_dtype),
        grid_spec=pltpu.PrefetchScalarGridSpec(
            num_scalar_prefetch=0,
            grid=grid,
            in_specs=[pl.BlockSpec((tile_r, lane), lambda i: (i, 0))],
            out_specs=pl.BlockSpec((tile_r, lane), lambda i: (i, 0)),
        ),
        compiler_params=pltpu.CompilerParams(
            dimension_semantics=("parallel",)
        ),
    )(x2d)

    if padded:
        return out2d.reshape(-1)[:n].reshape(orig_shape)
    return out2d.reshape(orig_shape)


def mish_ref(x):
    xf = x.astype(jnp.float32)
    sp = jnp.maximum(xf, 0.0) + jnp.log1p(jnp.exp(-jnp.abs(xf)))
    return (xf * jnp.tanh(sp)).astype(x.dtype)


if __name__ == "__main__":
    key = jax.random.PRNGKey(0)

    # NCHW, matching PyTorch conv-style tensors (no-pad, single-block path).
    x = jax.random.normal(key, (2, 4, 16, 16), dtype=jnp.float32) * 3.0
    y = jax.block_until_ready(mish(x))
    y_ref = mish_ref(x)
    assert y.shape == x.shape and y.dtype == x.dtype
    assert jnp.max(jnp.abs(y - y_ref)) < 1e-5, "mismatch vs reference"

    # Ragged size: exercises the pad path and the masked last-block (cdiv) path.
    x2 = jax.random.normal(jax.random.PRNGKey(1), (1, 3, 20, 23),
                           dtype=jnp.float32) * 3.0
    y2 = jax.block_until_ready(mish(x2, row_tile=8))
    y2_ref = mish_ref(x2)
    assert y2.shape == x2.shape and y2.dtype == x2.dtype
    assert jnp.max(jnp.abs(y2 - y2_ref)) < 1e-5, "mismatch vs reference (ragged)"

    print("KERNEL_OK")
</pallas_src>

<mosaic_0001>
module attributes {stable_mosaic.version = 11 : i64} {
  func.func @_mish_kernel(%arg0: i32, %arg1: memref<16x128xf32, #tpu.memory_space<vmem>>, %arg2: memref<16x128xf32, #tpu.memory_space<vmem>>) attributes {dimension_semantics = [#tpu.dimension_semantics<parallel>], iteration_bounds = array<i64: 1>, scalar_prefetch = 0 : i64, scratch_operands = 0 : i64, tpu.core_type = #tpu.core_type<tc>, window_params = [{transform_indices = @transform_0, window_bounds = array<i64: 16, 128>}, {transform_indices = @transform_1, window_bounds = array<i64: 16, 128>}]} {
    %c0 = arith.constant 0 : index
    %c0_0 = arith.constant 0 : index
    %0 = vector.load %arg1[%c0, %c0_0] : memref<16x128xf32, #tpu.memory_space<vmem>>, vector<16x128xf32>
    %1 = math.absf %0 : vector<16x128xf32>
    %cst = arith.constant 0.000000e+00 : f32
    %2 = vector.broadcast %cst : f32 to vector<16x128xf32>
    %3 = arith.subf %2, %1 : vector<16x128xf32>
    %4 = math.exp %3 : vector<16x128xf32>
    %cst_1 = arith.constant 2.000000e+00 : f32
    %5 = vector.broadcast %cst_1 : f32 to vector<16x128xf32>
    %6 = arith.mulf %5, %4 : vector<16x128xf32>
    %7 = arith.mulf %4, %4 : vector<16x128xf32>
    %cst_2 = arith.constant 0.000000e+00 : f32
    %8 = vector.broadcast %cst_2 : f32 to vector<16x128xf32>
    %9 = arith.cmpf oge, %0, %8 : vector<16x128xf32>
    %cst_3 = arith.constant 1.000000e+00 : f32
    %10 = vector.broadcast %cst_3 : f32 to vector<16x128xf32>
    %11 = arith.addf %10, %6 : vector<16x128xf32>
    %12 = arith.addf %7, %6 : vector<16x128xf32>
    %13 = arith.select %9, %11, %12 : vector<16x128xi1>, vector<16x128xf32>
    %cst_4 = arith.constant 1.000000e+00 : f32
    %14 = vector.broadcast %cst_4 : f32 to vector<16x128xf32>
    %15 = arith.addf %14, %6 : vector<16x128xf32>
    %cst_5 = arith.constant 2.000000e+00 : f32
    %16 = vector.broadcast %cst_5 : f32 to vector<16x128xf32>
    %17 = arith.mulf %16, %7 : vector<16x128xf32>
    %18 = arith.addf %15, %17 : vector<16x128xf32>
    %19 = arith.addf %7, %6 : vector<16x128xf32>
    %cst_6 = arith.constant 2.000000e+00 : f32
    %20 = vector.broadcast %cst_6 : f32 to vector<16x128xf32>
    %21 = arith.addf %19, %20 : vector<16x128xf32>
    %22 = arith.select %9, %18, %21 : vector<16x128xi1>, vector<16x128xf32>
    %23 = tpu.reciprocal %22 : vector<16x128xf32> -> vector<16x128xf32>
    %24 = arith.mulf %13, %23 : vector<16x128xf32>
    %25 = arith.mulf %0, %24 : vector<16x128xf32>
    %c0_7 = arith.constant 0 : index
    %c0_8 = arith.constant 0 : index
    %26 = vector.load %arg2[%c0_7, %c0_8] : memref<16x128xf32, #tpu.memory_space<vmem>>, vector<16x128xf32>
    tpu.vector_store %arg2[%c0_7, %c0_8], %25 {strides = array<i32>} : memref<16x128xf32, #tpu.memory_space<vmem>>, vector<16x128xf32>,
    return
  }
  func.func @transform_0(%arg0: i32) -> (i32, i32) {
    %c0_i32 = arith.constant 0 : i32
    %c0_i32_0 = arith.constant 0 : i32
    return %arg0, %c0_i32 : i32, i32
  }
  func.func @transform_1(%arg0: i32) -> (i32, i32) {
    %c0_i32 = arith.constant 0 : i32
    %c0_i32_0 = arith.constant 0 : i32
    return %arg0, %c0_i32 : i32, i32
  }
}

</mosaic_0001>

<bundles_post_ra>
// kernel: tpu_custom_call.1
= control target key start
LH: loop header
LB: loop body
LE: loop exit
PB: predicated region body
PF: predicated region fallthrough
CT: control target
= control target key end

     0   :  { %6 = vsyncpa [#allocation3], 0  ;;  %s216_s0 = inlined_call_operand.hbm [shape: f32[16,128], index: 0, kind: input, shape index: {}]   ;;  %s217_s1 = inlined_call_operand.hbm [shape: f32[16,128], index: 1, kind: output, shape index: {}]  }
   0x1   :  { %7 = vsyncpa [#allocation4], 0  ;;  %s12_s8 = sshll.u32 %s216_s0, 4  ;;  %s172_s9 = smov [#allocation2]   ;;  %s13_s8 = int_to_ptr.hbm [resolvable:$true] %s12_s8 }
   0x2   :  { %s14_s10 = sshll.u32 %s172_s9, 4  ;;  %s173_s11 = smov 128   ;;  %s15_s10 = int_to_ptr.vmem [resolvable:$true] %s14_s10 }
   0x3   :  { %s174_s12 = smov 8  }
   0x4   :  { %20 = dma.hbm_to_vmem [thread:$0]  %s13_s8, 256, %s15_s10, [#allocation3], %s173_s11, %s173_s11, %s174_s12  }
   0x5   :  { %168 = dma.done.wait [#allocation3], 256  }
   0x6   :  { %169 = vsyncadd [#allocation3], 4294967040  ;;  %v192_v0 = vld [vmem:[#allocation2] sm:$0xff]  ;;  %v194_v1 = vld [vmem:[#allocation2 + $0x8] sm:$0xff]  ;;  %s175_s0 = smov [#allocation5]   ;;  %s95_s16 = sshll.u32 %s217_s1, 4  ;;  %s96_s16 = int_to_ptr.hbm [resolvable:$true] %s95_s16 }
   0x7   :  { %v27_v2 = vand.u32 2147483647, %v192_v0  ;;  %v28_v3 = vand.u32 2147483647, %v194_v1  ;;  %vm39_vm0 = vcmp.ge.f32.partialorder %v192_v0, 0.0  ;;  %vm40_vm1 = vcmp.ge.f32.partialorder %v194_v1, 0.0 }
   0x8   :  { %s93_s13 = sshll.u32 %s175_s0, 4  ;;  %s94_s13 = int_to_ptr.vmem [resolvable:$true] %s93_s13 }
   0x9   :  { %v29_v4 = vsub.f32 0.0, %v27_v2  ;;  %v30_v5 = vsub.f32 0.0, %v28_v3 }
   0xb   :  { %v31_v6 = vmul.f32 1.442695, %v29_v4  ;;  %v33_v7 = vmul.f32 1.442695, %v30_v5 }
   0xd   :  { %112 = vpow2.f32 %v31_v6 }
   0xe   :  { %114 = vpow2.f32 %v33_v7 }
  0x13   :  { %v113_v8 = vpop.eup %112 }
  0x14   :  { %v115_v9 = vpop.eup %114  ;;  %v35_v10 = vmul.f32 2.0, %v113_v8  ;;  %v37_v11 = vmul.f32 %v113_v8, %v113_v8 }
  0x15   :  { %v36_v12 = vmul.f32 2.0, %v115_v9  ;;  %v38_v13 = vmul.f32 %v115_v9, %v115_v9 }
  0x16   :  { %v41_v14 = vadd.f32 1.0, %v35_v10  ;;  %v43_v15 = vadd.f32 %v37_v11, %v35_v10  ;;  %v47_v16 = vmul.f32 2.0, %v37_v11 }
  0x17   :  { %v42_v17 = vadd.f32 1.0, %v36_v12  ;;  %v44_v18 = vadd.f32 %v38_v13, %v36_v12  ;;  %v48_v19 = vmul.f32 2.0, %v38_v13 }
  0x18   :  { %v49_v20 = vadd.f32 %v47_v16, %v41_v14  ;;  %v51_v21 = vadd.f32 2.0, %v43_v15  ;;  %v45_v40 = vsel %vm39_vm0, %v41_v14, %v43_v15 }
  0x19   :  { %v50_v22 = vadd.f32 %v48_v19, %v42_v17  ;;  %v52_v23 = vadd.f32 2.0, %v44_v18  ;;  %v46_v45 = vsel %vm40_vm1, %v42_v17, %v44_v18 }
  0x1a   :  { %v53_v24 = vsel %vm39_vm0, %v49_v20, %v51_v21 }
  0x1b   :  { %116 = vrcp.f32 %v53_v24  ;;  %v54_v25 = vsel %vm40_vm1, %v50_v22, %v52_v23  ;;  %vm60_vm2 = vweird.f32 %v53_v24  ;;  %v66_v29 = vand.u32 2147483648, %v53_v24 }
  0x1c   :  { %118 = vrcp.f32 %v54_v25  ;;  %v64_v31 = vand.u32 2147483647, %v53_v24  ;;  %vm74_vm4 = vweird.f32 %v54_v25  ;;  %v80_v33 = vand.u32 2147483648, %v54_v25 }
  0x1d   :  { %v78_v36 = vand.u32 2147483647, %v54_v25  ;;  %v67_v37 = vor.u32 1.1754944e-38, %v66_v29 }
  0x1e   :  { %vm65_vm7 = vcmp.eq.f32.partialorder %v64_v31, 8.507059e+37  ;;  %v81_v41 = vor.u32 1.1754944e-38, %v80_v33 }
  0x1f   :  { %vm79_vm9 = vcmp.eq.f32.partialorder %v78_v36, 8.507059e+37 }
  0x21   :  { %v117_v26 = vpop.eup %116 }
  0x22   :  { %v56_v27 = vmul.f32 %v117_v26, %v53_v24  ;;  %v119_v28 = vpop.eup %118  ;;  %vm61_vm3 = vweird.f32 %v117_v26 }
  0x23   :  { %v70_v32 = vmul.f32 %v119_v28, %v54_v25  ;;  %vm75_vm5 = vweird.f32 %v119_v28  ;;  %vm62_vm6 = vmor %vm60_vm2, %vm61_vm3 }
  0x24   :  { %v57_v30 = vsub.f32 1.0, %v56_v27  ;;  %vm76_vm8 = vmor %vm74_vm4, %vm75_vm5 }
  0x25   :  { %v71_v35 = vsub.f32 1.0, %v70_v32 }
  0x26   :  { %v58_v34 = vmul.f32 %v117_v26, %v57_v30 }
  0x27   :  { %v72_v39 = vmul.f32 %v119_v28, %v71_v35 }
  0x28   :  { %v59_v38 = vadd.f32 %v117_v26, %v58_v34 }
  0x29   :  { %v73_v43 = vadd.f32 %v119_v28, %v72_v39 }
  0x2a   :  { %v63_v42 = vsel %vm62_vm6, %v117_v26, %v59_v38 }
  0x2b   :  { %v68_v44 = vsel %vm65_vm7, %v67_v37, %v63_v42  ;;  %v77_v47 = vsel %vm76_vm8, %v119_v28, %v73_v43 }
  0x2c   :  { %v83_v46 = vmul.f32 %v68_v44, %v45_v40  ;;  %v82_v48 = vsel %vm79_vm9, %v81_v41, %v77_v47 }
  0x2d   :  { %v84_v50 = vmul.f32 %v82_v48, %v46_v45 }
  0x2e   :  { %v85_v49 = vmul.f32 %v83_v46, %v192_v0 }
  0x2f   :  { %v86_v51 = vmul.f32 %v84_v50, %v194_v1 }
  0x30   :  { %87 = vst [vmem:[#allocation5] sm:$0xff] %v85_v49 }
  0x31   :  { %88 = vst [vmem:[#allocation5 + $0x8] sm:$0xff] %v86_v51 }
  0x32   :  { %101 = dma.vmem_to_hbm [thread:$0]  %s94_s13, 256, %s96_s16, [#allocation4], %s173_s11, %s173_s11, %s174_s12  }
  0x33   :  { %170 = dma.done.wait [#allocation4], 256  }
  0x34   :  { %171 = vsyncadd [#allocation4], 4294967040 }
  0x35   :  { %106 = vsyncpa [#allocation3], 1 }
  0x36   :  { %107 = vsyncpa [#allocation4], 1 }

</bundles_post_ra>
